<compile_context>
chip_gen: v7x
topology: tpu7x:2x2x1
jax: 0.10.0
libtpu: 0.0.40
codegen_flags: <defaults>
</compile_context>

<pallas_src>
import functools

import jax
import jax.numpy as jnp
from jax import lax
from jax.experimental import pallas as pl
from jax.experimental.pallas import tpu as pltpu

LAYER_DIMS = [400, 350, 300, 250, 1]      # input, fc1, fc2, fc3, output
IN_P = [400, 384, 384, 256]               # padded "in" dims per layer (fc1 in-dim un-padded)
OUT_P = [384, 384, 256]                   # padded "out" dims for fc1..fc3
OUT4_P = 128                              # padded out dim of the final layer (row 0 real)

_STEP_OVERHEAD_ROWS = 384  # ~0.35 us per grid step expressed in batch rows of MXU work


def _round_up(x, m):
    return ((x + m - 1) // m) * m


def _choose_tile_b(B):
    """Pick the batch tile: single minimally-padded tile for small/awkward B,
    otherwise a 128-multiple tile minimizing padding + per-step overhead with
    n_b >= 2 (v7x megacore)."""
    if B <= 512:
        return _round_up(B, 16)
    best = None
    for t in (1024, 512, 256, 128):
        n_b = -(-B // t)
        if n_b < 2:            # keep >= 2 grid steps so both v7x TCs get work
            continue
        pad = n_b * t - B
        score = pad + _STEP_OVERHEAD_ROWS * n_b
        if best is None or score < best[0]:
            best = (score, t)
    return best[1]


def mlp_kernel(x_ref, w1_ref, b1_ref, w2_ref, b2_ref,
               w3_ref, b3_ref, w4_ref, b4_ref, o_ref):
    # fc1 + relu: f32 activations cast to bf16 on the VPU, MXU matmul, f32 acc.
    h = jnp.dot(x_ref[...].astype(jnp.bfloat16), w1_ref[...],
                preferred_element_type=jnp.float32)
    h = jnp.maximum(h + b1_ref[...], 0.0)
    # dropout1: identity (eval mode)
    # fc2 + relu
    h = jnp.dot(h.astype(jnp.bfloat16), w2_ref[...],
                preferred_element_type=jnp.float32)
    h = jnp.maximum(h + b2_ref[...], 0.0)
    # dropout2: identity (eval mode)
    # fc3 + relu
    h = jnp.dot(h.astype(jnp.bfloat16), w3_ref[...],
                preferred_element_type=jnp.float32)
    h = jnp.maximum(h + b3_ref[...], 0.0)
    # dropout3: identity (eval mode)
    # output layer, computed transposed: w4 is stored [out_pad, in_pad] so the
    # contraction on the last dims (A @ B^T, the standard attention pattern)
    # puts the batch on lanes -> only the single real output row is stored.
    z = lax.dot_general(
        w4_ref[...], h.astype(jnp.bfloat16),
        dimension_numbers=(((1,), (1,)), ((), ())),
        preferred_element_type=jnp.float32)            # [OUT4_P, tile_b]
    zrow = z[0:1, :] + b4_ref[0]                       # [1, tile_b], scalar bias from SMEM
    # Exact sigmoid (exp on EUP, one tiny divide on a single row).
    o_ref[...] = 1.0 / (1.0 + jnp.exp(-zrow))


def prepare_params(params):
    """One-time prep outside the hot path.
    fc1..fc3: PyTorch [out, in] f32 -> padded [in_p, out_p] bf16 + [1, out_p] f32 bias.
    output:   kept [out, in], padded to [OUT4_P, in_p] bf16 + scalar (1,) f32 bias (SMEM)."""
    prepped = []
    for k, name in enumerate(["fc1", "fc2", "fc3"]):
        w, b = params[name]
        wt = jnp.transpose(w).astype(jnp.float32)                      # [in, out]
        wp = jnp.pad(wt, ((0, IN_P[k] - wt.shape[0]),
                          (0, OUT_P[k] - wt.shape[1])))
        prepped.append(wp.astype(jnp.bfloat16))
        bp = jnp.pad(b.astype(jnp.float32),
                     (0, OUT_P[k] - b.shape[0])).reshape(1, OUT_P[k])
        prepped.append(bp)
    w4, b4 = params["output"]                                          # [1, 250], [1]
    w4p = jnp.pad(w4.astype(jnp.float32),
                  ((0, OUT4_P - w4.shape[0]), (0, IN_P[3] - w4.shape[1])))
    prepped.append(w4p.astype(jnp.bfloat16))
    prepped.append(b4.astype(jnp.float32).reshape(1))                  # scalar bias
    return tuple(prepped)


def dnns2_forward(x, prepped):
    """x: [B, 400] float32. prepped: output of prepare_params.
    Returns [B, 1] float32 (sigmoid probabilities)."""
    B, d_in = x.shape
    assert d_in == LAYER_DIMS[0], x.shape
    w1, b1, w2, b2, w3, b3, w4, b4 = prepped

    tile_b = _choose_tile_b(B)
    Bp = _round_up(B, tile_b)
    n_b = Bp // tile_b

    xp = x.astype(jnp.float32)
    if Bp != B:
        # Only the (minimized) batch rows are padded; no feature pad, no cast pass.
        xp = jnp.pad(xp, ((0, Bp - B), (0, 0)))

    x_spec = pl.BlockSpec((tile_b, d_in), lambda i: (i, 0))
    # Constant index_map -> weight/bias blocks stay resident in VMEM across the grid.
    resident = lambda arr: pl.BlockSpec(arr.shape, lambda i: (0, 0))
    b4_spec = pl.BlockSpec(memory_space=pltpu.MemorySpace.SMEM)        # scalar bias
    # Batch-on-lanes output: (n_b, 1, tile_b), 4 B/row of writeback, lane-dense.
    out_spec = pl.BlockSpec((None, 1, tile_b), lambda i: (i, 0, 0))

    in_specs = [x_spec,
                resident(w1), resident(b1),
                resident(w2), resident(b2),
                resident(w3), resident(b3),
                resident(w4), b4_spec]

    flops = 2 * Bp * (IN_P[0] * OUT_P[0] + IN_P[1] * OUT_P[1]
                      + IN_P[2] * OUT_P[2] + IN_P[3] * OUT4_P)
    w_bytes = sum(int(w.size) * 2 for w in (w1, w2, w3, w4)) \
        + sum(int(b.size) * 4 for b in (b1, b2, b3, b4))
    bytes_accessed = Bp * d_in * 4 + w_bytes + Bp * 4

    out = pl.pallas_call(
        mlp_kernel,
        out_shape=jax.ShapeDtypeStruct((n_b, 1, tile_b), jnp.float32),
        grid_spec=pltpu.PrefetchScalarGridSpec(
            num_scalar_prefetch=0,
            grid=(n_b,),
            in_specs=in_specs,
            out_specs=out_spec,
        ),
        compiler_params=pltpu.CompilerParams(
            dimension_semantics=("parallel",)),
        cost_estimate=pl.CostEstimate(
            flops=flops,
            transcendentals=Bp,
            bytes_accessed=bytes_accessed),
    )(xp, w1, b1, w2, b2, w3, b3, w4, b4)

    # (n_b, 1, tile_b) -> (Bp, 1); strip batch padding.
    return out.reshape(Bp, 1)[:B]


def init_params(key, input_dim=400):
    """Deterministic init mimicking nn.Linear default (uniform +/- 1/sqrt(fan_in))."""
    layer_dims = [(input_dim, 350), (350, 300), (300, 250), (250, 1)]
    names = ["fc1", "fc2", "fc3", "output"]
    params = {}
    for name, (din, dout) in zip(names, layer_dims):
        key, kw, kb = jax.random.split(key, 3)
        bound = 1.0 / jnp.sqrt(jnp.float32(din))
        w = jax.random.uniform(kw, (dout, din), jnp.float32, -bound, bound)
        b = jax.random.uniform(kb, (dout,), jnp.float32, -bound, bound)
        params[name] = (w, b)
    return params


def _reference(x, params):
    """Pure-JAX reference mimicking the kernel's bf16-input / f32-accumulate math."""
    def lin(h, w, b):
        return jnp.dot(h.astype(jnp.bfloat16), w.T.astype(jnp.bfloat16),
                       preferred_element_type=jnp.float32) + b.astype(jnp.float32)

    (w1, b1), (w2, b2), (w3, b3), (w4, b4) = (
        params["fc1"], params["fc2"], params["fc3"], params["output"])
    h = jax.nn.relu(lin(x.astype(jnp.float32), w1, b1))
    h = jax.nn.relu(lin(h, w2, b2))
    h = jax.nn.relu(lin(h, w3, b3))
    return jax.nn.sigmoid(lin(h, w4, b4))


if __name__ == "__main__":
    key = jax.random.PRNGKey(0)
    kp, kx = jax.random.split(key)
    params = init_params(kp, input_dim=400)
    prepped = prepare_params(params)
    x = jax.random.normal(kx, (2, 400), jnp.float32)  # small batch

    fwd = jax.jit(functools.partial(dnns2_forward, prepped=prepped))
    y = fwd(x)
    jax.block_until_ready(y)

    y_ref = _reference(x, params)
    assert y.shape == (2, 1), y.shape
    err = float(jnp.max(jnp.abs(y - y_ref)))
    assert err < 5e-3, f"mismatch vs reference: {err}"
    print("KERNEL_OK")
</pallas_src>

<mosaic_0001>
module attributes {stable_mosaic.version = 11 : i64} {
  func.func @mlp_kernel(%arg0: i32, %arg1: memref<16x400xf32, #tpu.memory_space<vmem>>, %arg2: memref<400x384xbf16, #tpu.memory_space<vmem>>, %arg3: memref<1x384xf32, #tpu.memory_space<vmem>>, %arg4: memref<384x384xbf16, #tpu.memory_space<vmem>>, %arg5: memref<1x384xf32, #tpu.memory_space<vmem>>, %arg6: memref<384x256xbf16, #tpu.memory_space<vmem>>, %arg7: memref<1x256xf32, #tpu.memory_space<vmem>>, %arg8: memref<128x256xbf16, #tpu.memory_space<vmem>>, %arg9: memref<1xf32, #tpu.memory_space<smem>>, %arg10: memref<1x1x16xf32, #tpu.memory_space<vmem>>) attributes {dimension_semantics = [#tpu.dimension_semantics<parallel>], iteration_bounds = array<i64: 1>, scalar_prefetch = 0 : i64, scratch_operands = 0 : i64, tpu.core_type = #tpu.core_type<tc>, window_params = [{transform_indices = @transform_0, window_bounds = array<i64: 16, 400>}, {pipeline_mode = #tpu.pipeline_mode<synchronous>, transform_indices = @transform_1, window_bounds = array<i64: 400, 384>}, {pipeline_mode = #tpu.pipeline_mode<synchronous>, transform_indices = @transform_2, window_bounds = array<i64: 1, 384>}, {pipeline_mode = #tpu.pipeline_mode<synchronous>, transform_indices = @transform_3, window_bounds = array<i64: 384, 384>}, {pipeline_mode = #tpu.pipeline_mode<synchronous>, transform_indices = @transform_4, window_bounds = array<i64: 1, 384>}, {pipeline_mode = #tpu.pipeline_mode<synchronous>, transform_indices = @transform_5, window_bounds = array<i64: 384, 256>}, {pipeline_mode = #tpu.pipeline_mode<synchronous>, transform_indices = @transform_6, window_bounds = array<i64: 1, 256>}, {pipeline_mode = #tpu.pipeline_mode<synchronous>, transform_indices = @transform_7, window_bounds = array<i64: 128, 256>}, {transform_indices = @transform_8, window_bounds = array<i64: 1>}, {transform_indices = @transform_9, window_bounds = array<i64: 1, 1, 16>}]} {
    %c0 = arith.constant 0 : index
    %c0_0 = arith.constant 0 : index
    %0 = vector.load %arg1[%c0, %c0_0] : memref<16x400xf32, #tpu.memory_space<vmem>>, vector<16x400xf32>
    %1 = arith.truncf %0 : vector<16x400xf32> to vector<16x400xbf16>
    %c0_1 = arith.constant 0 : index
    %c0_2 = arith.constant 0 : index
    %2 = vector.load %arg2[%c0_1, %c0_2] : memref<400x384xbf16, #tpu.memory_space<vmem>>, vector<400x384xbf16>
    %cst = arith.constant dense<0.000000e+00> : vector<16x384xf32>
    %3 = tpu.matmul %1, %2, %cst {dimension_numbers = #tpu.dot_dimension_numbers<[1], [0], [0], [1], [0, 0, 1, 1], [], []>} : vector<16x400xbf16>, vector<400x384xbf16>, vector<16x384xf32> -> vector<16x384xf32>
    %c0_3 = arith.constant 0 : index
    %c0_4 = arith.constant 0 : index
    %4 = vector.load %arg3[%c0_3, %c0_4] : memref<1x384xf32, #tpu.memory_space<vmem>>, vector<1x384xf32>
    %5 = vector.broadcast %4 : vector<1x384xf32> to vector<16x384xf32>
    %6 = arith.addf %3, %5 : vector<16x384xf32>
    %cst_5 = arith.constant 0.000000e+00 : f32
    %7 = vector.broadcast %cst_5 : f32 to vector<16x384xf32>
    %8 = arith.maximumf %6, %7 : vector<16x384xf32>
    %9 = arith.truncf %8 : vector<16x384xf32> to vector<16x384xbf16>
    %c0_6 = arith.constant 0 : index
    %c0_7 = arith.constant 0 : index
    %10 = vector.load %arg4[%c0_6, %c0_7] : memref<384x384xbf16, #tpu.memory_space<vmem>>, vector<384x384xbf16>
    %cst_8 = arith.constant dense<0.000000e+00> : vector<16x384xf32>
    %11 = tpu.matmul %9, %10, %cst_8 {dimension_numbers = #tpu.dot_dimension_numbers<[1], [0], [0], [1], [0, 0, 1, 1], [], []>} : vector<16x384xbf16>, vector<384x384xbf16>, vector<16x384xf32> -> vector<16x384xf32>
    %c0_9 = arith.constant 0 : index
    %c0_10 = arith.constant 0 : index
    %12 = vector.load %arg5[%c0_9, %c0_10] : memref<1x384xf32, #tpu.memory_space<vmem>>, vector<1x384xf32>
    %13 = vector.broadcast %12 : vector<1x384xf32> to vector<16x384xf32>
    %14 = arith.addf %11, %13 : vector<16x384xf32>
    %cst_11 = arith.constant 0.000000e+00 : f32
    %15 = vector.broadcast %cst_11 : f32 to vector<16x384xf32>
    %16 = arith.maximumf %14, %15 : vector<16x384xf32>
    %17 = arith.truncf %16 : vector<16x384xf32> to vector<16x384xbf16>
    %c0_12 = arith.constant 0 : index
    %c0_13 = arith.constant 0 : index
    %18 = vector.load %arg6[%c0_12, %c0_13] : memref<384x256xbf16, #tpu.memory_space<vmem>>, vector<384x256xbf16>
    %cst_14 = arith.constant dense<0.000000e+00> : vector<16x256xf32>
    %19 = tpu.matmul %17, %18, %cst_14 {dimension_numbers = #tpu.dot_dimension_numbers<[1], [0], [0], [1], [0, 0, 1, 1], [], []>} : vector<16x384xbf16>, vector<384x256xbf16>, vector<16x256xf32> -> vector<16x256xf32>
    %c0_15 = arith.constant 0 : index
    %c0_16 = arith.constant 0 : index
    %20 = vector.load %arg7[%c0_15, %c0_16] : memref<1x256xf32, #tpu.memory_space<vmem>>, vector<1x256xf32>
    %21 = vector.broadcast %20 : vector<1x256xf32> to vector<16x256xf32>
    %22 = arith.addf %19, %21 : vector<16x256xf32>
    %cst_17 = arith.constant 0.000000e+00 : f32
    %23 = vector.broadcast %cst_17 : f32 to vector<16x256xf32>
    %24 = arith.maximumf %22, %23 : vector<16x256xf32>
    %c0_18 = arith.constant 0 : index
    %c0_19 = arith.constant 0 : index
    %25 = vector.load %arg8[%c0_18, %c0_19] : memref<128x256xbf16, #tpu.memory_space<vmem>>, vector<128x256xbf16>
    %26 = arith.truncf %24 : vector<16x256xf32> to vector<16x256xbf16>
    %cst_20 = arith.constant dense<0.000000e+00> : vector<128x16xf32>
    %27 = tpu.matmul %25, %26, %cst_20 {dimension_numbers = #tpu.dot_dimension_numbers<[1], [1], [0], [0], [0, 0, 1, 0], [], []>} : vector<128x256xbf16>, vector<16x256xbf16>, vector<128x16xf32> -> vector<128x16xf32>
    %28 = vector.extract_strided_slice %27 {offsets = [0, 0], sizes = [1, 16], strides = [1, 1]} : vector<128x16xf32> to vector<1x16xf32>
    %c0_21 = arith.constant 0 : index
    %29 = memref.load %arg9[%c0_21] : memref<1xf32, #tpu.memory_space<smem>>
    %30 = vector.broadcast %29 : f32 to vector<1x16xf32>
    %31 = arith.addf %28, %30 : vector<1x16xf32>
    %cst_22 = arith.constant 0.000000e+00 : f32
    %32 = vector.broadcast %cst_22 : f32 to vector<1x16xf32>
    %33 = arith.subf %32, %31 : vector<1x16xf32>
    %34 = math.exp %33 : vector<1x16xf32>
    %cst_23 = arith.constant 1.000000e+00 : f32
    %35 = vector.broadcast %cst_23 : f32 to vector<1x16xf32>
    %36 = arith.addf %35, %34 : vector<1x16xf32>
    %cst_24 = arith.constant 1.000000e+00 : f32
    %37 = vector.broadcast %cst_24 : f32 to vector<1x16xf32>
    %38 = arith.divf %37, %36 : vector<1x16xf32>
    %c0_25 = arith.constant 0 : index
    %c0_26 = arith.constant 0 : index
    %c0_27 = arith.constant 0 : index
    %39 = vector.load %arg10[%c0_25, %c0_26, %c0_27] : memref<1x1x16xf32, #tpu.memory_space<vmem>>, vector<1x1x16xf32>
    %40 = vector.shape_cast %39 : vector<1x1x16xf32> to vector<1x16xf32>
    %41 = vector.shape_cast %38 : vector<1x16xf32> to vector<1x1x16xf32>
    tpu.vector_store %arg10[%c0_25, %c0_26, %c0_27], %41 {strides = array<i32>} : memref<1x1x16xf32, #tpu.memory_space<vmem>>, vector<1x1x16xf32>,
    return
  }
  func.func @transform_0(%arg0: i32) -> (i32, i32) {
    %c0_i32 = arith.constant 0 : i32
    %c0_i32_0 = arith.constant 0 : i32
    return %arg0, %c0_i32 : i32, i32
  }
  func.func @transform_1(%arg0: i32) -> (i32, i32) {
    %c0_i32 = arith.constant 0 : i32
    %c0_i32_0 = arith.constant 0 : i32
    %c0_i32_1 = arith.constant 0 : i32
    return %c0_i32, %c0_i32_0 : i32, i32
  }
  func.func @transform_2(%arg0: i32) -> (i32, i32) {
    %c0_i32 = arith.constant 0 : i32
    %c0_i32_0 = arith.constant 0 : i32
    %c0_i32_1 = arith.constant 0 : i32
    return %c0_i32, %c0_i32_0 : i32, i32
  }
  func.func @transform_3(%arg0: i32) -> (i32, i32) {
    %c0_i32 = arith.constant 0 : i32
    %c0_i32_0 = arith.constant 0 : i32
    %c0_i32_1 = arith.constant 0 : i32
    return %c0_i32, %c0_i32_0 : i32, i32
  }
  func.func @transform_4(%arg0: i32) -> (i32, i32) {
    %c0_i32 = arith.constant 0 : i32
    %c0_i32_0 = arith.constant 0 : i32
    %c0_i32_1 = arith.constant 0 : i32
    return %c0_i32, %c0_i32_0 : i32, i32
  }
  func.func @transform_5(%arg0: i32) -> (i32, i32) {
    %c0_i32 = arith.constant 0 : i32
    %c0_i32_0 = arith.constant 0 : i32
    %c0_i32_1 = arith.constant 0 : i32
    return %c0_i32, %c0_i32_0 : i32, i32
  }
  func.func @transform_6(%arg0: i32) -> (i32, i32) {
    %c0_i32 = arith.constant 0 : i32
    %c0_i32_0 = arith.constant 0 : i32
    %c0_i32_1 = arith.constant 0 : i32
    return %c0_i32, %c0_i32_0 : i32, i32
  }
  func.func @transform_7(%arg0: i32) -> (i32, i32) {
    %c0_i32 = arith.constant 0 : i32
    %c0_i32_0 = arith.constant 0 : i32
    %c0_i32_1 = arith.constant 0 : i32
    return %c0_i32, %c0_i32_0 : i32, i32
  }
  func.func @transform_8(%arg0: i32) -> i32 {
    %c0_i32 = arith.constant 0 : i32
    %c0_i32_0 = arith.constant 0 : i32
    return %c0_i32 : i32
  }
  func.func @transform_9(%arg0: i32) -> (i32, i32, i32) {
    %c0_i32 = arith.constant 0 : i32
    %c0_i32_0 = arith.constant 0 : i32
    %c0_i32_1 = arith.constant 0 : i32
    return %arg0, %c0_i32, %c0_i32_0 : i32, i32, i32
  }
}

</mosaic_0001>

<bundles_post_ra>
// kernel: dnns2_forward.1
= control target key start
LH: loop header
LB: loop body
LE: loop exit
PB: predicated region body
PF: predicated region fallthrough
CT: control target
= control target key end

     0   :  { %v2612_v48 = vmov 0   ;;  %vm563_vm0 = vcmask 130048   ;;  %vm2614_vm1 = vmmov 0   ;;  %vm1997_vm2 = vcmask 122880   ;;  %s3382_s1 = inlined_call_operand.vmem [shape: bf16[400,384], index: 1, kind: input, shape index: {}]   ;;  %s3383_s0 = inlined_call_operand.vmem [shape: f32[16,400], index: 0, kind: input, shape index: {}]   ;;  %s3384_s3 = inlined_call_operand.vmem [shape: bf16[384,384], index: 3, kind: input, shape index: {}]   ;;  %s3385_s5 = inlined_call_operand.vmem [shape: bf16[384,256], index: 5, kind: input, shape index: {}]   ;;  %s3386_s2 = inlined_call_operand.vmem [shape: f32[1,384], index: 2, kind: input, shape index: {}]   ;;  %s3387_s4 = inlined_call_operand.vmem [shape: f32[1,384], index: 4, kind: input, shape index: {}]   ;;  %s3388_s7 = inlined_call_operand.vmem [shape: bf16[128,256], index: 7, kind: input, shape index: {}]   ;;  %s3389_s6 = inlined_call_operand.vmem [shape: f32[1,256], index: 6, kind: input, shape index: {}]   ;;  %s3390_s8 = inlined_call_operand.<no memory space> [shape: f32[1], index: 8, kind: input, shape index: {}]   ;;  %s3391_s9 = inlined_call_operand.vmem [shape: f32[1,1,16], index: 9, kind: output, shape index: {}]  }
   0x1   :  { %v2316_v0 = vld [vmem:[%s3382_s1 + $0x4] ss:$12 sps:$4 sm:$0xff]   ;;  %v2318_v1 = vld [vmem:[%s3382_s1] ss:$12 sps:$4 sm:$0xff]   ;;  %v2319_v2 = vld [vmem:[%s3382_s1 + $0x1c] ss:$12 sps:$4 sm:$0xff]  }
   0x2   :  { %567 = vmatprep.subr.bf16.mxu0 %v2316_v0  ;;  %v2321_v3 = vld [vmem:[%s3382_s1 + $0x18] ss:$12 sps:$4 sm:$0xff]   ;;  %v2322_v4 = vld [vmem:[%s3382_s1 + $0x34] ss:$12 sps:$4 sm:$0xff]   ;;  %v2324_v5 = vld [vmem:[%s3382_s1 + $0x30] ss:$12 sps:$4 sm:$0xff]  }
   0x3   :  { %568 = vmatpush1.bf16.msra.mxu0 %v2318_v1  ;;  %v2325_v6 = vld [vmem:[%s3382_s1 + $0x4c] ss:$12 sps:$4 sm:$0xff]   ;;  %v2327_v7 = vld [vmem:[%s3382_s1 + $0x48] ss:$12 sps:$4 sm:$0xff]   ;;  %v2328_v8 = vld [vmem:[%s3382_s1 + $0x64] ss:$12 sps:$4 sm:$0xff]  }
   0x4   :  { %569 = vmatprep.subr.bf16.mxu0 %v2319_v2  ;;  %v2342_v9 = vld [vmem:[%s3382_s1 + $0xc8] ss:$12 sps:$4 sm:$0xff]   ;;  %v2330_v11 = vld [vmem:[%s3382_s1 + $0x60] ss:$12 sps:$4 sm:$0xff]   ;;  %v2333_v15 = vld [vmem:[%s3382_s1 + $0x78] ss:$12 sps:$4 sm:$0xff]  }
   0x5   :  { %v2344_v10 = vld [vmem:[%s3382_s1 + $0x8] ss:$12 sps:$4 sm:$0xff]   ;;  %2216 = vmatprep.subr.bf16.mxu1 %v2342_v9  ;;  %v2347_v12 = vld [vmem:[%s3382_s1 + $0xe0] ss:$12 sps:$4 sm:$0xff]   ;;  %v2352_v17 = vld [vmem:[%s3382_s1 + $0xf8] ss:$12 sps:$4 sm:$0xff]  }
   0x6   :  { %2217 = vmatpush3.bf16.msra.mxu1 %v2344_v10  ;;  %v2331_v13 = vld [vmem:[%s3382_s1 + $0x7c] ss:$12 sps:$4 sm:$0xff]   ;;  %v2349_v14 = vld [vmem:[%s3382_s1 + $0x20] ss:$12 sps:$4 sm:$0xff]   ;;  %v2354_v18 = vld [vmem:[%s3382_s1 + $0x38] ss:$12 sps:$4 sm:$0xff]  }
   0x7   :  { %570 = vmatpush1.bf16.msra.mxu0 %v2321_v3  ;;  %2218 = vmatprep.subr.bf16.mxu1 %v2347_v12  ;;  %v2334_v16 = vld [vmem:[%s3382_s1 + $0x94] ss:$12 sps:$4 sm:$0xff]   ;;  %v2336_v19 = vld [vmem:[%s3382_s1 + $0x90] ss:$12 sps:$4 sm:$0xff]   ;;  %v2337_v22 = vld [vmem:[%s3382_s1 + $0xac] ss:$12 sps:$4 sm:$0xff]  }
   0x8   :  { %571 = vmatprep.subr.bf16.mxu0 %v2322_v4  ;;  %v2357_v20 = vld [vmem:[%s3382_s1 + $0x110] ss:$12 sps:$4 sm:$0xff]   ;;  %v2362_v23 = vld [vmem:[%s3382_s1 + $0x128] ss:$12 sps:$4 sm:$0xff]   ;;  %v2367_v27 = vld [vmem:[%s3382_s1 + $0x140] ss:$12 sps:$4 sm:$0xff]  }
   0x9   :  { %v2359_v21 = vld [vmem:[%s3382_s1 + $0x50] ss:$12 sps:$4 sm:$0xff]   ;;  %v2339_v24 = vld [vmem:[%s3382_s1 + $0xa8] ss:$12 sps:$4 sm:$0xff]   ;;  %v2343_v28 = vld [vmem:[%s3382_s1 + $0xc0] ss:$12 sps:$4 sm:$0xff]  }
   0xa   :  { %2219 = vmatpush3.bf16.msra.mxu1 %v2349_v14  ;;  %v2364_v25 = vld [vmem:[%s3382_s1 + $0x68] ss:$12 sps:$4 sm:$0xff]   ;;  %v2340_v26 = vld [vmem:[%s3382_s1 + $0xc4] ss:$12 sps:$4 sm:$0xff]   ;;  %v2369_v29 = vld [vmem:[%s3382_s1 + $0x80] ss:$12 sps:$4 sm:$0xff]  }
   0xb   :  { %572 = vmatpush1.bf16.msra.mxu0 %v2324_v5  ;;  %2220 = vmatprep.subr.bf16.mxu1 %v2352_v17  ;;  %v2345_v30 = vld [vmem:[%s3382_s1 + $0xdc] ss:$12 sps:$4 sm:$0xff]   ;;  %v2372_v31 = vld [vmem:[%s3382_s1 + $0x158] ss:$12 sps:$4 sm:$0xff]   ;;  %v2350_v33 = vld [vmem:[%s3382_s1 + $0xf4] ss:$12 sps:$4 sm:$0xff]  }
   0xc   :  { %573 = vmatprep.subr.bf16.mxu0 %v2325_v6  ;;  %v2348_v32 = vld [vmem:[%s3382_s1 + $0xd8] ss:$12 sps:$4 sm:$0xff]   ;;  %v2377_v35 = vld [vmem:[%s3382_s1 + $0x170] ss:$12 sps:$4 sm:$0xff]   ;;  %v35_v36 = vld [vmem:[%s3383_s0 + $0x8] sm:$0xff] }
   0xd   :  { %v2374_v34 = vld [vmem:[%s3382_s1 + $0x98] ss:$12 sps:$4 sm:$0xff]   ;;  %v39_v37 = vld [vmem:[%s3383_s0 + $0x28] sm:$0xff]  ;;  %v2353_v38 = vld [vmem:[%s3382_s1 + $0xf0] ss:$12 sps:$4 sm:$0xff]  }
   0xe   :  { %2221 = vmatpush3.bf16.msra.mxu1 %v2354_v18  ;;  %v43_v39 = vpack.c.bf16 %v39_v37, %v35_v36  ;;  %v2379_v40 = vld [vmem:[%s3382_s1 + $0xb0] ss:$12 sps:$4 sm:$0xff]   ;;  %v34_v41 = vld [vmem:[%s3383_s0] sm:$0xff]  ;;  %v2355_v43 = vld [vmem:[%s3382_s1 + $0x10c] ss:$12 sps:$4 sm:$0xff]  }
   0xf   :  { %574 = vmatpush1.bf16.msra.mxu0 %v2327_v7  ;;  %2222 = vmatprep.subr.bf16.mxu1 %v2357_v20  ;;  %v38_v42 = vld [vmem:[%s3383_s0 + $0x20] sm:$0xff]  ;;  %v2358_v44 = vld [vmem:[%s3382_s1 + $0x108] ss:$12 sps:$4 sm:$0xff]   ;;  %v2373_v55 = vld [vmem:[%s3382_s1 + $0x150] ss:$12 sps:$4 sm:$0xff]  }
  0x10   :  { %575 = vmatprep.subr.bf16.mxu0 %v2328_v8  ;;  %599 = vmatprep.mubr.bf16.mxu0 %v43_v39  ;;  %v42_v45 = vpack.c.bf16 %v38_v42, %v34_v41  ;;  %v2383_v46 = vld [vmem:[%s3382_s1 + $0x188] ss:$12 sps:$4 sm:$0xff]   ;;  %v2360_v47 = vld [vmem:[%s3382_s1 + $0x124] ss:$12 sps:$4 sm:$0xff]   ;;  %v2363_v49 = vld [vmem:[%s3382_s1 + $0x120] ss:$12 sps:$4 sm:$0xff]  }
  0x11   :  { %685 = vmatprep.mubr.bf16.mxu1 %v43_v39  ;;  %v2387_v50 = vld [vmem:[%s3382_s1 + $0x1a0] ss:$12 sps:$4 sm:$0xff]   ;;  %v2365_v51 = vld [vmem:[%s3382_s1 + $0x13c] ss:$12 sps:$4 sm:$0xff]   ;;  %v2368_v52 = vld [vmem:[%s3382_s1 + $0x138] ss:$12 sps:$4 sm:$0xff]  }
  0x12   :  { %2223 = vmatpush3.bf16.msra.mxu1 %v2359_v21  ;;  %v2391_v53 = vld [vmem:[%s3382_s1 + $0x1b8] ss:$12 sps:$4 sm:$0xff]   ;;  %v2370_v54 = vld [vmem:[%s3382_s1 + $0x154] ss:$12 sps:$4 sm:$0xff]   ;;  %v2395_v56 = vld [vmem:[%s3382_s1 + $0x1d0] ss:$12 sps:$4 sm:$0xff]  }
  0x13   :  { %576 = vmatpush1.bf16.msra.mxu0 %v2330_v11  ;;  %2224 = vmatprep.subr.bf16.mxu1 %v2362_v23  ;;  %v2375_v57 = vld [vmem:[%s3382_s1 + $0x16c] ss:$12 sps:$4 sm:$0xff]   ;;  %v2378_v58 = vld [vmem:[%s3382_s1 + $0x168] ss:$12 sps:$4 sm:$0xff]   ;;  %v2382_v61 = vld [vmem:[%s3382_s1 + $0x184] ss:$12 sps:$4 sm:$0xff]  }
  0x14   :  { %577 = vmatprep.subr.bf16.mxu0 %v2331_v13  ;;  %v2399_v59 = vld [vmem:[%s3382_s1 + $0x1e8] ss:$12 sps:$4 sm:$0xff]   ;;  %v37_v60 = vld [vmem:[%s3383_s0 + $0x18] sm:$0xff]  ;;  %v2380_v0 = vld [vmem:[%s3382_s1 + $0x180] ss:$12 sps:$4 sm:$0xff]  }
  0x15   :  { %v41_v62 = vld [vmem:[%s3383_s0 + $0x38] sm:$0xff]  ;;  %v2403_v1 = vld [vmem:[%s3382_s1 + $0x200] ss:$12 sps:$4 sm:$0xff]   ;;  %v2392_v9 = vld [vmem:[%s3382_s1 + $0x1c8] ss:$12 sps:$4 sm:$0xff]  }
  0x16   :  { %2225 = vmatpush3.bf16.msra.mxu1 %v2364_v25  ;;  %v45_v63 = vpack.c.bf16 %v41_v62, %v37_v60  ;;  %v2386_v2 = vld [vmem:[%s3382_s1 + $0x19c] ss:$12 sps:$4 sm:$0xff]   ;;  %v2384_v3 = vld [vmem:[%s3382_s1 + $0x198] ss:$12 sps:$4 sm:$0xff]   ;;  %v2390_v5 = vld [vmem:[%s3382_s1 + $0x1b4] ss:$12 sps:$4 sm:$0xff]  }
  0x17   :  { %578 = vmatpush1.bf16.msra.mxu0 %v2333_v15  ;;  %2226 = vmatprep.subr.bf16.mxu1 %v2367_v27  ;;  %v2407_v4 = vld [vmem:[%s3382_s1 + $0x218] ss:$12 sps:$4 sm:$0xff]   ;;  %v2388_v6 = vld [vmem:[%s3382_s1 + $0x1b0] ss:$12 sps:$4 sm:$0xff]   ;;  %v2415_v10 = vld [vmem:[%s3382_s1 + $0x248] ss:$12 sps:$4 sm:$0xff]  }
  0x18   :  { %579 = vmatprep.subr.bf16.mxu0 %v2334_v16  ;;  %v2411_v7 = vld [vmem:[%s3382_s1 + $0x230] ss:$12 sps:$4 sm:$0xff]   ;;  %v2394_v8 = vld [vmem:[%s3382_s1 + $0x1cc] ss:$12 sps:$4 sm:$0xff]   ;;  %v2406_v21 = vld [vmem:[%s3382_s1 + $0x214] ss:$12 sps:$4 sm:$0xff]  }
  0x19   :  { %v2398_v11 = vld [vmem:[%s3382_s1 + $0x1e4] ss:$12 sps:$4 sm:$0xff]   ;;  %v2396_v15 = vld [vmem:[%s3382_s1 + $0x1e0] ss:$12 sps:$4 sm:$0xff]   ;;  %v2402_v17 = vld [vmem:[%s3382_s1 + $0x1fc] ss:$12 sps:$4 sm:$0xff]  }
  0x1a   :  { %2227 = vmatpush3.bf16.msra.mxu1 %v2369_v29  ;;  %v36_v12 = vld [vmem:[%s3383_s0 + $0x10] sm:$0xff]  ;;  %v2416_v18 = vld [vmem:[%s3384_s3] ss:$12 sps:$4 sm:$0xff]   ;;  %v2400_v20 = vld [vmem:[%s3382_s1 + $0x1f8] ss:$12 sps:$4 sm:$0xff]  }
  0x1b   :  { %580 = vmatpush1.bf16.msra.mxu0 %v2336_v19  ;;  %2228 = vmatprep.subr.bf16.mxu1 %v2372_v31  ;;  %v40_v13 = vld [vmem:[%s3383_s0 + $0x30] sm:$0xff]  ;;  %v2421_v19 = vld [vmem:[%s3384_s3 + $0x1c] ss:$12 sps:$4 sm:$0xff]   ;;  %v2410_v25 = vld [vmem:[%s3382_s1 + $0x22c] ss:$12 sps:$4 sm:$0xff]  }
  0x1c   :  { %581 = vmatprep.subr.bf16.mxu0 %v2337_v22  ;;  %v2418_v14 = vld [vmem:[%s3384_s3 + $0x4] ss:$12 sps:$4 sm:$0xff]   ;;  %v44_v16 = vpack.c.bf16 %v40_v13, %v36_v12  ;;  %v2424_v23 = vld [vmem:[%s3384_s3 + $0x34] ss:$12 sps:$4 sm:$0xff]   ;;  %v2427_v27 = vld [vmem:[%s3384_s3 + $0x4c] ss:$12 sps:$4 sm:$0xff]  }
  0x1d   :  { %v2419_v22 = vld [vmem:[%s3384_s3 + $0x18] ss:$12 sps:$4 sm:$0xff]   ;;  %v2425_v29 = vld [vmem:[%s3384_s3 + $0x48] ss:$12 sps:$4 sm:$0xff]   ;;  %v2448_v39 = vld [vmem:[%s3384_s3 + $0xe0] ss:$12 sps:$4 sm:$0xff]  }
  0x1e   :  { %2229 = vmatpush3.bf16.msra.mxu1 %v2374_v34  ;;  %v2430_v31 = vld [vmem:[%s3384_s3 + $0x64] ss:$12 sps:$4 sm:$0xff]   ;;  %v2433_v34 = vld [vmem:[%s3384_s3 + $0x7c] ss:$12 sps:$4 sm:$0xff]   ;;  %v2449_v41 = vld [vmem:[%s3384_s3 + $0x20] ss:$12 sps:$4 sm:$0xff]  }
  0x1f   :  { %582 = vmatpush1.bf16.msra.mxu0 %v2339_v24  ;;  %2230 = vmatprep.subr.bf16.mxu1 %v2377_v35  ;;  %v2404_v24 = vld [vmem:[%s3382_s1 + $0x210] ss:$12 sps:$4 sm:$0xff]   ;;  %v2443_v35 = vld [vmem:[%s3384_s3 + $0xc8] ss:$12 sps:$4 sm:$0xff]   ;;  %v2431_v36 = vld [vmem:[%s3384_s3 + $0x78] ss:$12 sps:$4 sm:$0xff]  }
  0x20   :  { %583 = vmatprep.subr.bf16.mxu0 %v2340_v26  ;;  %v2422_v26 = vld [vmem:[%s3384_s3 + $0x30] ss:$12 sps:$4 sm:$0xff]   ;;  %v2444_v37 = vld [vmem:[%s3384_s3 + $0x8] ss:$12 sps:$4 sm:$0xff]   ;;  %v2439_v42 = vld [vmem:[%s3384_s3 + $0xac] ss:$12 sps:$4 sm:$0xff]  }
  0x21   :  { %v2464_v60 = vld [vmem:[%s3384_s3 + $0x68] ss:$12 sps:$4 sm:$0xff]  }
  0x22   :  { %2231 = vmatpush3.bf16.msra.mxu1 %v2379_v40  ;;  %v2434_v40 = vld [vmem:[%s3384_s3 + $0x90] ss:$12 sps:$4 sm:$0xff]  }
  0x23   :  { %584 = vmatpush1.bf16.msra.mxu0 %v2343_v28  ;;  %694 = vmatprep.subr.bf16.mxu1 %v2612_v48  ;;  %v2408_v28 = vld [vmem:[%s3382_s1 + $0x228] ss:$12 sps:$4 sm:$0xff]  }
  0x24   :  { %585 = vmatprep.subr.bf16.mxu0 %v2345_v30  ;;  %v2414_v30 = vld [vmem:[%s3382_s1 + $0x244] ss:$12 sps:$4 sm:$0xff]   ;;  %v2467_v62 = vld [vmem:[%s3384_s3 + $0x13c] ss:$12 sps:$4 sm:$0xff]  }
  0x25   :  { %686 = vmatmul.mubr.bf16.vlgmr.msra.gmra.mrb[0].mxu1 %v42_v45 }
  0x26   :  { %695 = vmatpush1.bf16.msra.mxu1 %v2383_v46  ;;  %2079 = vmatprep.mubr.msk.bf16.mxu1 %vm563_vm0, %v45_v63  ;;  %v2442_v46 = vld [vmem:[%s3384_s3 + $0xc4] ss:$12 sps:$4 sm:$0xff]  }
  0x27   :  { %586 = vmatpush1.bf16.msra.mxu0 %v2348_v32  ;;  %696 = vmatprep.subr.bf16.mxu1 %v2612_v48  ;;  %v2412_v32 = vld [vmem:[%s3382_s1 + $0x240] ss:$12 sps:$4 sm:$0xff]  }
  0x28   :  { %587 = vmatprep.subr.bf16.mxu0 %v2350_v33  ;;  %v2428_v33 = vld [vmem:[%s3384_s3 + $0x60] ss:$12 sps:$4 sm:$0xff]  }
  0x2a   :  { %697 = vmatpush1.bf16.msra.mxu1 %v2387_v50  ;;  %v2459_v50 = vld [vmem:[%s3384_s3 + $0x50] ss:$12 sps:$4 sm:$0xff]  }
  0x2b   :  { %588 = vmatpush1.bf16.msra.mxu0 %v2353_v38  ;;  %698 = vmatprep.subr.bf16.mxu1 %v2612_v48  ;;  %v2436_v38 = vld [vmem:[%s3384_s3 + $0x94] ss:$12 sps:$4 sm:$0xff]  }
  0x2c   :  { %589 = vmatprep.subr.bf16.mxu0 %v2355_v43  ;;  %v2453_v43 = vld [vmem:[%s3384_s3 + $0xf8] ss:$12 sps:$4 sm:$0xff]  }
  0x2e   :  { %699 = vmatpush1.bf16.msra.mxu1 %v2391_v53  ;;  %v2445_v53 = vld [vmem:[%s3384_s3 + $0xd8] ss:$12 sps:$4 sm:$0xff]  }
  0x2f   :  { %590 = vmatpush1.bf16.msra.mxu0 %v2358_v44  ;;  %700 = vmatprep.subr.bf16.mxu1 %v2612_v48  ;;  %v2437_v44 = vld [vmem:[%s3384_s3 + $0xa8] ss:$12 sps:$4 sm:$0xff]  }
  0x30   :  { %591 = vmatprep.subr.bf16.mxu0 %v2360_v47  ;;  %v2458_v47 = vld [vmem:[%s3384_s3 + $0x110] ss:$12 sps:$4 sm:$0xff]  }
  0x32   :  { %701 = vmatpush1.bf16.msra.mxu1 %v2395_v56  ;;  %v2457_v56 = vld [vmem:[%s3384_s3 + $0x10c] ss:$12 sps:$4 sm:$0xff]  }
  0x33   :  { %592 = vmatpush1.bf16.msra.mxu0 %v2363_v49  ;;  %702 = vmatprep.subr.bf16.mxu1 %v2612_v48  ;;  %v2440_v49 = vld [vmem:[%s3384_s3 + $0xc0] ss:$12 sps:$4 sm:$0xff]  }
  0x34   :  { %593 = vmatprep.subr.bf16.mxu0 %v2365_v51  ;;  %v2447_v51 = vld [vmem:[%s3384_s3 + $0xdc] ss:$12 sps:$4 sm:$0xff]  }
  0x36   :  { %703 = vmatpush1.bf16.msra.mxu1 %v2399_v59  ;;  %v2460_v59 = vld [vmem:[%s3384_s3 + $0x120] ss:$12 sps:$4 sm:$0xff]  }
  0x37   :  { %594 = vmatpush1.bf16.msra.mxu0 %v2368_v52  ;;  %704 = vmatprep.subr.bf16.mxu1 %v2612_v48  ;;  %v2463_v52 = vld [vmem:[%s3384_s3 + $0x128] ss:$12 sps:$4 sm:$0xff]  }
  0x38   :  { %595 = vmatprep.subr.bf16.mxu0 %v2370_v54  ;;  %v2452_v54 = vld [vmem:[%s3384_s3 + $0xf4] ss:$12 sps:$4 sm:$0xff]  }
  0x3a   :  { %705 = vmatpush1.bf16.msra.mxu1 %v2403_v1  ;;  %v2472_v1 = vld [vmem:[%s3384_s3 + $0x154] ss:$12 sps:$4 sm:$0xff]  }
  0x3b   :  { %596 = vmatpush1.bf16.msra.mxu0 %v2373_v55  ;;  %706 = vmatprep.subr.bf16.mxu1 %v2612_v48  ;;  %v2450_v55 = vld [vmem:[%s3384_s3 + $0xf0] ss:$12 sps:$4 sm:$0xff]  }
  0x3c   :  { %597 = vmatprep.subr.bf16.mxu0 %v2375_v57  ;;  %v2455_v57 = vld [vmem:[%s3384_s3 + $0x108] ss:$12 sps:$4 sm:$0xff]  }
  0x3e   :  { %707 = vmatpush1.bf16.msra.mxu1 %v2407_v4  ;;  %v2474_v4 = vld [vmem:[%s3384_s3 + $0x98] ss:$12 sps:$4 sm:$0xff]  }
  0x3f   :  { %598 = vmatpush1.bf16.msra.mxu0 %v2378_v58  ;;  %708 = vmatprep.subr.bf16.mxu1 %v2612_v48  ;;  %v2462_v58 = vld [vmem:[%s3384_s3 + $0x124] ss:$12 sps:$4 sm:$0xff]  }
  0x40   :  { %610 = vmatprep.subr.bf16.mxu0 %v2382_v61  ;;  %v2465_v61 = vld [vmem:[%s3384_s3 + $0x138] ss:$12 sps:$4 sm:$0xff]  }
  0x42   :  { %600 = vmatmul.mubr.bf16.vlgmr.msra.gmra.mrb[0].mxu0 %v42_v45  ;;  %709 = vmatpush1.bf16.msra.mxu1 %v2411_v7  ;;  %v2454_v45 = vld [vmem:[%s3384_s3 + $0x38] ss:$12 sps:$4 sm:$0xff]   ;;  %v2475_v7 = vld [vmem:[%s3384_s3 + $0x168] ss:$12 sps:$4 sm:$0xff]  }
  0x43   :  { %611 = vmatpush1.bf16.msra.mxu0 %v2380_v0  ;;  %2078 = vmatprep.mubr.msk.bf16.mxu0 %vm563_vm0, %v45_v63  ;;  %v2468_v63 = vld [vmem:[%s3384_s3 + $0x140] ss:$12 sps:$4 sm:$0xff]  }
  0x44   :  { %612 = vmatprep.subr.bf16.mxu0 %v2386_v2  ;;  %710 = vmatprep.subr.bf16.mxu1 %v2612_v48  ;;  %v2469_v0 = vld [vmem:[%s3384_s3 + $0x80] ss:$12 sps:$4 sm:$0xff]   ;;  %v2473_v2 = vld [vmem:[%s3384_s3 + $0x158] ss:$12 sps:$4 sm:$0xff]  }
  0x46   :  { %711 = vmatpush1.bf16.msra.mxu1 %v2415_v10  ;;  %v2613_v10 = vmov 0.0  }
  0x47   :  { %613 = vmatpush1.bf16.msra.mxu0 %v2384_v3  ;;  %1241 = vmatprep.subr.bf16.mxu1 %v2418_v14  ;;  %v2470_v3 = vld [vmem:[%s3384_s3 + $0x150] ss:$12 sps:$4 sm:$0xff]  }
  0x48   :  { %614 = vmatprep.subr.bf16.mxu0 %v2390_v5  ;;  %v2477_v5 = vld [vmem:[%s3384_s3 + $0x16c] ss:$12 sps:$4 sm:$0xff]  }
  0x49   :  { %727 = vmatmul.mubr.bf16.vlgmr.msra.gmra.mrb[4].mxu1 %v44_v16 }
  0x4a   :  { %1242 = vmatpush1.bf16.msra.mxu1 %v2416_v18 }
  0x4b   :  { %615 = vmatpush1.bf16.msra.mxu0 %v2388_v6  ;;  %1243 = vmatprep.subr.bf16.mxu1 %v2421_v19  ;;  %v2478_v6 = vld [vmem:[%s3384_s3 + $0x170] ss:$12 sps:$4 sm:$0xff]  }
  0x4c   :  { %616 = vmatprep.subr.bf16.mxu0 %v2394_v8  ;;  %v2479_v8 = vld [vmem:[%s3384_s3 + $0xb0] ss:$12 sps:$4 sm:$0xff]  }
  0x4e   :  { %1244 = vmatpush1.bf16.msra.mxu1 %v2419_v22 }
  0x4f   :  { %617 = vmatpush1.bf16.msra.mxu0 %v2392_v9  ;;  %1245 = vmatprep.subr.bf16.mxu1 %v2424_v23  ;;  %v2482_v9 = vld [vmem:[%s3384_s3 + $0x184] ss:$12 sps:$4 sm:$0xff]  }
  0x50   :  { %618 = vmatprep.subr.bf16.mxu0 %v2398_v11 }
  0x52   :  { %1246 = vmatpush1.bf16.msra.mxu1 %v2422_v26 }
  0x53   :  { %619 = vmatpush1.bf16.msra.mxu0 %v2396_v15  ;;  %1247 = vmatprep.subr.bf16.mxu1 %v2427_v27 }
  0x54   :  { %620 = vmatprep.subr.bf16.mxu0 %v2402_v17  ;;  %v148_v17 = vlaneseq }
  0x56   :  { %1248 = vmatpush1.bf16.msra.mxu1 %v2425_v29  ;;  %v3073_v18 = vshrl.u32 %v148_v17, 7  ;;  %v2523_v17 = vld [vmem:[%s3385_s5 + $0x34] ss:$8 sps:$4 sm:$0xff]  }
  0x57   :  { %621 = vmatpush1.bf16.msra.mxu0 %v2400_v20  ;;  %1249 = vmatprep.subr.bf16.mxu1 %v2430_v31  ;;  %v146_v20 = vld [vmem:[%s3386_s2] sm:$0x7] }
  0x58   :  { %622 = vmatprep.subr.bf16.mxu0 %v2406_v21  ;;  %v158_v19 = vsub.s32 2, %v3073_v18 }
  0x5a   :  { %1250 = vmatpush1.bf16.msra.mxu1 %v2428_v33  ;;  %v159_v21 = vrot.slane %v146_v20, %v158_v19  ;;  %v3084_v33 = vsub.s32 0, %v3073_v18 }
  0x5b   :  { %623 = vmatpush1.bf16.msra.mxu0 %v2404_v24  ;;  %1251 = vmatprep.subr.bf16.mxu1 %v2433_v34  ;;  %v3087_v34 = vsub.s32 1, %v3073_v18 }
  0x5c   :  { %624 = vmatprep.subr.bf16.mxu0 %v2410_v25 }
  0x5e   :  { %1252 = vmatpush1.bf16.msra.mxu1 %v2431_v36  ;;  %v155_v36 = vrot.slane %v146_v20, %v3087_v34 }
  0x5f   :  { %625 = vmatpush1.bf16.msra.mxu0 %v2408_v28  ;;  %1253 = vmatprep.subr.bf16.mxu1 %v2436_v38 }
  0x60   :  { %626 = vmatprep.subr.bf16.mxu0 %v2414_v30 }
  0x62   :  { %1254 = vmatpush1.bf16.msra.mxu1 %v2434_v40 }
  0x63   :  { %627 = vmatpush1.bf16.msra.mxu0 %v2412_v32  ;;  %1255 = vmatprep.subr.bf16.mxu1 %v2439_v42 }
  0x64   :  { %2238 = vmatprep.subr.bf16.mxu0 %v2443_v35  ;;  %v151_v35 = vrot.slane %v146_v20, %v3084_v33  ;;  %v2521_v20 = vld [vmem:[%s3385_s5 + $0x30] ss:$8 sps:$4 sm:$0xff]  }
  0x66   :  { %643 = vmatmul.mubr.bf16.vlgmr.msra.gmra.mrb[0].mxu0 %v44_v16  ;;  %1256 = vmatpush1.bf16.msra.mxu1 %v2437_v44 }
  0x67   :  { %2239 = vmatpush3.bf16.msra.mxu0 %v2444_v37  ;;  %1257 = vmatprep.subr.bf16.mxu1 %v2442_v46 }
  0x68   :  { %2240 = vmatprep.subr.bf16.mxu0 %v2448_v39 }
  0x6a   :  { %1258 = vmatpush1.bf16.msra.mxu1 %v2440_v49 }
  0x6b   :  { %2241 = vmatpush3.bf16.msra.mxu0 %v2449_v41  ;;  %1259 = vmatprep.subr.bf16.mxu1 %v2447_v51 }
  0x6c   :  { %2242 = vmatprep.subr.bf16.mxu0 %v2453_v43 }
  0x6e   :  { %1260 = vmatpush1.bf16.msra.mxu1 %v2445_v53  ;;  %v2483_v53 = vld [vmem:[%s3384_s3 + $0x188] ss:$12 sps:$4 sm:$0xff]  }
  0x6f   :  { %2243 = vmatpush3.bf16.msra.mxu0 %v2454_v45  ;;  %1261 = vmatprep.subr.bf16.mxu1 %v2452_v54  ;;  %v2486_v54 = vld [vmem:[%s3384_s3 + $0x19c] ss:$12 sps:$4 sm:$0xff]  }
  0x70   :  { %2244 = vmatprep.subr.bf16.mxu0 %v2458_v47 }
  0x72   :  { %1262 = vmatpush1.bf16.msra.mxu1 %v2450_v55  ;;  %v2484_v55 = vld [vmem:[%s3384_s3 + $0x198] ss:$12 sps:$4 sm:$0xff]  }
  0x73   :  { %2245 = vmatpush3.bf16.msra.mxu0 %v2459_v50  ;;  %1263 = vmatprep.subr.bf16.mxu1 %v2457_v56  ;;  %v2487_v56 = vld [vmem:[%s3384_s3 + $0x1a0] ss:$12 sps:$4 sm:$0xff]  }
  0x74   :  { %2246 = vmatprep.subr.bf16.mxu0 %v2463_v52  ;;  %v2480_v52 = vld [vmem:[%s3384_s3 + $0x180] ss:$12 sps:$4 sm:$0xff]  }
  0x76   :  { %1264 = vmatpush1.bf16.msra.mxu1 %v2455_v57  ;;  %v2490_v57 = vld [vmem:[%s3384_s3 + $0x1b4] ss:$12 sps:$4 sm:$0xff]  }
  0x77   :  { %1265 = vmatprep.subr.bf16.mxu1 %v2462_v58  ;;  %2247 = vmatpush3.bf16.msra.mxu0 %v2464_v60  ;;  %v2488_v58 = vld [vmem:[%s3384_s3 + $0x1b0] ss:$12 sps:$4 sm:$0xff]   ;;  %v2494_v60 = vld [vmem:[%s3384_s3 + $0x1cc] ss:$12 sps:$4 sm:$0xff]  }
  0x78   :  { %2248 = vmatprep.subr.bf16.mxu0 %v2468_v63  ;;  %v2498_v63 = vld [vmem:[%s3384_s3 + $0x1e4] ss:$12 sps:$4 sm:$0xff]  }
  0x7a   :  { %1266 = vmatpush1.bf16.msra.mxu1 %v2460_v59  ;;  %v2491_v59 = vld [vmem:[%s3384_s3 + $0x1b8] ss:$12 sps:$4 sm:$0xff]  }
  0x7b   :  { %1267 = vmatprep.subr.bf16.mxu1 %v2467_v62  ;;  %2249 = vmatpush3.bf16.msra.mxu0 %v2469_v0  ;;  %v2495_v62 = vld [vmem:[%s3384_s3 + $0x1d0] ss:$12 sps:$4 sm:$0xff]   ;;  %v2496_v0 = vld [vmem:[%s3384_s3 + $0x1e0] ss:$12 sps:$4 sm:$0xff]  }
  0x7c   :  { %2250 = vmatprep.subr.bf16.mxu0 %v2473_v2  ;;  %v2502_v2 = vld [vmem:[%s3384_s3 + $0x1fc] ss:$12 sps:$4 sm:$0xff]  }
  0x7e   :  { %1268 = vmatpush1.bf16.msra.mxu1 %v2465_v61  ;;  %v2492_v61 = vld [vmem:[%s3384_s3 + $0x1c8] ss:$12 sps:$4 sm:$0xff]  }
  0x7f   :  { %1269 = vmatprep.subr.bf16.mxu1 %v2472_v1  ;;  %2251 = vmatpush3.bf16.msra.mxu0 %v2474_v4  ;;  %v2499_v1 = vld [vmem:[%s3384_s3 + $0x1e8] ss:$12 sps:$4 sm:$0xff]   ;;  %v2503_v4 = vld [vmem:[%s3384_s3 + $0x200] ss:$12 sps:$4 sm:$0xff]  }
  0x80   :  { %2252 = vmatprep.subr.bf16.mxu0 %v2478_v6  ;;  %v2504_v6 = vld [vmem:[%s3384_s3 + $0x210] ss:$12 sps:$4 sm:$0xff]  }
  0x82   :  { %1270 = vmatpush1.bf16.msra.mxu1 %v2470_v3  ;;  %v2500_v3 = vld [vmem:[%s3384_s3 + $0x1f8] ss:$12 sps:$4 sm:$0xff]  }
  0x83   :  { %1271 = vmatprep.subr.bf16.mxu1 %v2477_v5  ;;  %2253 = vmatpush3.bf16.msra.mxu0 %v2479_v8  ;;  %v2506_v5 = vld [vmem:[%s3384_s3 + $0x214] ss:$12 sps:$4 sm:$0xff]   ;;  %v2510_v8 = vld [vmem:[%s3384_s3 + $0x22c] ss:$12 sps:$4 sm:$0xff]  }
  0x84   :  { %2269 = vmatprep.subr.bf16.mxu0 %v2613_v10 }
  0x86   :  { %1272 = vmatpush1.bf16.msra.mxu1 %v2475_v7  ;;  %v2507_v7 = vld [vmem:[%s3384_s3 + $0x218] ss:$12 sps:$4 sm:$0xff]  }
  0x87   :  { %1284 = vmatprep.subr.bf16.mxu1 %v2482_v9  ;;  %v2508_v9 = vld [vmem:[%s3384_s3 + $0x228] ss:$12 sps:$4 sm:$0xff]  }
  0xf8   :  { %v2232_v11 = vpop.f32.mrb[0].mxu1 }
  0xf9   :  { %v2233_v12 = vpop.f32.mrb[1].mxu1 }
  0xfa   :  { %v2234_v13 = vadd.f32 %v2233_v12, %v2232_v11  ;;  %v2235_v14 = vpop.f32.mrb[2].mxu1  ;;  %v2511_v11 = vld [vmem:[%s3384_s3 + $0x230] ss:$12 sps:$4 sm:$0xff]   ;;  %v2514_v12 = vld [vmem:[%s3385_s5 + $0x4] ss:$8 sps:$4 sm:$0xff]  }
  0xfb   :  { %v2236_v15 = vpop.f32.mrb[3].mxu1 }
  0xfc   :  { %v2237_v16 = vadd.f32 %v2236_v15, %v2235_v14  ;;  %v688_v22 = vadd.f32 %v2234_v13, %v159_v21  ;;  %v2512_v13 = vld [vmem:[%s3385_s5] ss:$8 sps:$4 sm:$0xff]   ;;  %v2517_v14 = vld [vmem:[%s3385_s5 + $0x14] ss:$8 sps:$4 sm:$0xff]   ;;  %v2520_v15 = vld [vmem:[%s3385_s5 + $0x24] ss:$8 sps:$4 sm:$0xff]  }
  0xfe   :  { %v691_v23 = vadd.f32 %v2237_v16, %v159_v21  ;;  %v2518_v16 = vld [vmem:[%s3385_s5 + $0x20] ss:$8 sps:$4 sm:$0xff]   ;;  %v2526_v21 = vld [vmem:[%s3385_s5 + $0x44] ss:$8 sps:$4 sm:$0xff]  }
 0x11c   :  { %v728_v24 = vpop.f32.mrb[4].mxu1 }
 0x11d   :  { %v729_v25 = vadd.f32 %v728_v24, %v688_v22  ;;  %v730_v26 = vpop.f32.mrb[5].mxu1  ;;  %v2524_v22 = vld [vmem:[%s3385_s5 + $0x40] ss:$8 sps:$4 sm:$0xff]   ;;  %v2527_v24 = vld [vmem:[%s3385_s5 + $0x50] ss:$8 sps:$4 sm:$0xff]  }
 0x11e   :  { %v731_v27 = vpop.f32.mrb[6].mxu1  ;;  %v2530_v26 = vld [vmem:[%s3385_s5 + $0x60] ss:$8 sps:$4 sm:$0xff]  }
 0x11f   :  { %v737_v28 = vmax.f32 %v729_v25, 0.0  ;;  %v732_v29 = vadd.f32 %v731_v27, %v691_v23  ;;  %v733_v30 = vpop.f32.mrb[7].mxu1  ;;  %v2529_v23 = vld [vmem:[%s3385_s5 + $0x54] ss:$8 sps:$4 sm:$0xff]   ;;  %v2532_v25 = vld [vmem:[%s3385_s5 + $0x64] ss:$8 sps:$4 sm:$0xff]  }
 0x120   :  { %v2533_v27 = vld [vmem:[%s3385_s5 + $0x70] ss:$8 sps:$4 sm:$0xff]   ;;  %v2536_v30 = vld [vmem:[%s3385_s5 + $0x80] ss:$8 sps:$4 sm:$0xff]  }
 0x121   :  { %v740_v31 = vmax.f32 %v732_v29, 0.0  ;;  %v2538_v29 = vld [vmem:[%s3385_s5 + $0x84] ss:$8 sps:$4 sm:$0xff]  }
 0x123   :  { %v3081_v32 = vpack.c.bf16 %v740_v31, %v737_v28  ;;  %v2535_v28 = vld [vmem:[%s3385_s5 + $0x74] ss:$8 sps:$4 sm:$0xff]  }
 0x124   :  { %v2541_v31 = vld [vmem:[%s3385_s5 + $0x94] ss:$8 sps:$4 sm:$0xff]  }
 0x139   :  { %v644_v37 = vpop.f32.mrb[0].mxu0 }
 0x13a   :  { %v2289_v38 = vadd.f32 %v644_v37, %v151_v35  ;;  %v646_v39 = vpop.f32.mrb[1].mxu0  ;;  %v2547_v37 = vld [vmem:[%s3385_s5 + $0xb4] ss:$8 sps:$4 sm:$0xff]  }
 0x13b   :  { %v2290_v40 = vadd.f32 %v646_v39, %v155_v36  ;;  %v648_v41 = vpop.f32.mrb[2].mxu0  ;;  %v2550_v39 = vld [vmem:[%s3385_s5 + $0xc4] ss:$8 sps:$4 sm:$0xff]  }
 0x13c   :  { %v2291_v42 = vadd.f32 %v648_v41, %v151_v35  ;;  %v650_v43 = vpop.f32.mrb[3].mxu0  ;;  %v735_v45 = vmax.f32 %v2289_v38, 0.0  ;;  %v2544_v35 = vld [vmem:[%s3385_s5 + $0xa4] ss:$8 sps:$4 sm:$0xff]   ;;  %v2545_v38 = vld [vmem:[%s3385_s5 + $0xb0] ss:$8 sps:$4 sm:$0xff]  }
 0x13d   :  { %v2292_v44 = vadd.f32 %v650_v43, %v155_v36  ;;  %v736_v47 = vmax.f32 %v2290_v40, 0.0  ;;  %v2542_v36 = vld [vmem:[%s3385_s5 + $0xa0] ss:$8 sps:$4 sm:$0xff]   ;;  %v2553_v41 = vld [vmem:[%s3385_s5 + $0xd4] ss:$8 sps:$4 sm:$0xff]  }
 0x13e   :  { %v738_v46 = vmax.f32 %v2291_v42, 0.0  ;;  %v2548_v40 = vld [vmem:[%s3385_s5 + $0xc0] ss:$8 sps:$4 sm:$0xff]   ;;  %v2551_v42 = vld [vmem:[%s3385_s5 + $0xd0] ss:$8 sps:$4 sm:$0xff]  }
 0x13f   :  { %v739_v49 = vmax.f32 %v2292_v44, 0.0  ;;  %v2556_v43 = vld [vmem:[%s3385_s5 + $0xe4] ss:$8 sps:$4 sm:$0xff]   ;;  %v2554_v44 = vld [vmem:[%s3385_s5 + $0xe0] ss:$8 sps:$4 sm:$0xff]  }
 0x140   :  { %v741_v50 = vpack.c.bf16 %v738_v46, %v735_v45  ;;  %v2559_v45 = vld [vmem:[%s3385_s5 + $0xf4] ss:$8 sps:$4 sm:$0xff]   ;;  %v2557_v46 = vld [vmem:[%s3385_s5 + $0xf0] ss:$8 sps:$4 sm:$0xff]  }
 0x141   :  { %v742_v51 = vpack.c.bf16 %v739_v49, %v736_v47  ;;  %v2562_v47 = vld [vmem:[%s3385_s5 + $0x104] ss:$8 sps:$4 sm:$0xff]  }
 0x143   :  { %1273 = vmatprep.mubr.bf16.mxu1 %v742_v51  ;;  %1359 = vmatprep.mubr.bf16.mxu0 %v742_v51 }
 0x144   :  { %1274 = vmatmul.mubr.bf16.vlgmr.msra.gmra.mrb[8].mxu1 %v741_v50  ;;  %1360 = vmatmul.mubr.bf16.vlgmr.msra.gmra.mrb[4].mxu0 %v741_v50 }
 0x145   :  { %1285 = vmatpush1.bf16.msra.mxu1 %v2480_v52  ;;  %2270 = vmatpush3.bf16.msra.mxu0 %v2483_v53 }
 0x146   :  { %1286 = vmatprep.subr.bf16.mxu1 %v2486_v54  ;;  %2271 = vmatprep.subr.bf16.mxu0 %v2613_v10 }
 0x147   :  { %1316 = vmatprep.mubr.bf16.mxu1 %v2612_v48  ;;  %2285 = vmatprep.mubr.msk.bf16.mxu0 %vm2614_vm1, %v2613_v10 }
 0x149   :  { %1287 = vmatpush1.bf16.msra.mxu1 %v2484_v55  ;;  %2272 = vmatpush3.bf16.msra.mxu0 %v2487_v56  ;;  %v840_v55 = vld [vmem:[%s3387_s4] sm:$0x7] }
 0x14a   :  { %1288 = vmatprep.subr.bf16.mxu1 %v2490_v57  ;;  %2273 = vmatprep.subr.bf16.mxu0 %v2613_v10  ;;  %v853_v56 = vrot.slane %v840_v55, %v158_v19  ;;  %v845_v57 = vrot.slane %v840_v55, %v3084_v33 }
 0x14d   :  { %1289 = vmatpush1.bf16.msra.mxu1 %v2488_v58  ;;  %2274 = vmatpush3.bf16.msra.mxu0 %v2491_v59  ;;  %v849_v58 = vrot.slane %v840_v55, %v3087_v34  ;;  %v2589_v55 = vld [vmem:[%s3388_s7 + $0x10] ss:$8 sps:$4 sm:$0xff]  }
 0x14e   :  { %1290 = vmatprep.subr.bf16.mxu1 %v2494_v60  ;;  %2275 = vmatprep.subr.bf16.mxu0 %v2613_v10 }
 0x151   :  { %1291 = vmatpush1.bf16.msra.mxu1 %v2492_v61  ;;  %2276 = vmatpush3.bf16.msra.mxu0 %v2495_v62 }
 0x152   :  { %1292 = vmatprep.subr.bf16.mxu1 %v2498_v63  ;;  %2277 = vmatprep.subr.bf16.mxu0 %v2613_v10 }
 0x155   :  { %1293 = vmatpush1.bf16.msra.mxu1 %v2496_v0  ;;  %2278 = vmatpush3.bf16.msra.mxu0 %v2499_v1 }
 0x156   :  { %1294 = vmatprep.subr.bf16.mxu1 %v2502_v2  ;;  %2279 = vmatprep.subr.bf16.mxu0 %v2613_v10 }
 0x159   :  { %1295 = vmatpush1.bf16.msra.mxu1 %v2500_v3  ;;  %2280 = vmatpush3.bf16.msra.mxu0 %v2503_v4 }
 0x15a   :  { %1296 = vmatprep.subr.bf16.mxu1 %v2506_v5  ;;  %2281 = vmatprep.subr.bf16.mxu0 %v2613_v10 }
 0x15d   :  { %1297 = vmatpush1.bf16.msra.mxu1 %v2504_v6  ;;  %2282 = vmatpush3.bf16.msra.mxu0 %v2507_v7 }
 0x15e   :  { %1298 = vmatprep.subr.bf16.mxu1 %v2510_v8  ;;  %2283 = vmatprep.subr.bf16.mxu0 %v2613_v10  ;;  %v2515_v10 = vld [vmem:[%s3385_s5 + $0x10] ss:$8 sps:$4 sm:$0xff]  }
 0x161   :  { %1299 = vmatpush1.bf16.msra.mxu1 %v2508_v9  ;;  %2284 = vmatpush3.bf16.msra.mxu0 %v2511_v11 }
 0x162   :  { %1718 = vmatprep.subr.bf16.mxu0 %v2514_v12 }
 0x164   :  { %1317 = vmatmul.mubr.bf16.vlgmr.msra.gmra.mrb[8].mxu1 %v3081_v32  ;;  %2286 = vmatmul.mubr.bf16.vlgmr.msra.gmra.mrb[8].mxu0 %v3081_v32  ;;  %v2539_v32 = vld [vmem:[%s3385_s5 + $0x90] ss:$8 sps:$4 sm:$0xff]  }
 0x165   :  { %1719 = vmatpush1.bf16.msra.mxu0 %v2512_v13 }
 0x166   :  { %1720 = vmatprep.subr.bf16.mxu0 %v2517_v14 }
 0x169   :  { %1721 = vmatpush1.bf16.msra.mxu0 %v2515_v10 }
 0x16a   :  { %1722 = vmatprep.subr.bf16.mxu0 %v2520_v15 }
 0x16d   :  { %1723 = vmatpush1.bf16.msra.mxu0 %v2518_v16 }
 0x16e   :  { %1724 = vmatprep.subr.bf16.mxu0 %v2523_v17 }
 0x171   :  { %1725 = vmatpush1.bf16.msra.mxu0 %v2521_v20  ;;  %v2560_v20 = vld [vmem:[%s3385_s5 + $0x100] ss:$8 sps:$4 sm:$0xff]  }
 0x172   :  { %1726 = vmatprep.subr.bf16.mxu0 %v2526_v21  ;;  %v2565_v21 = vld [vmem:[%s3385_s5 + $0x114] ss:$8 sps:$4 sm:$0xff]  }
 0x175   :  { %1727 = vmatpush1.bf16.msra.mxu0 %v2524_v22  ;;  %v2563_v22 = vld [vmem:[%s3385_s5 + $0x110] ss:$8 sps:$4 sm:$0xff]  }
 0x176   :  { %1728 = vmatprep.subr.bf16.mxu0 %v2529_v23  ;;  %v2568_v23 = vld [vmem:[%s3385_s5 + $0x124] ss:$8 sps:$4 sm:$0xff]  }
 0x179   :  { %1729 = vmatpush1.bf16.msra.mxu0 %v2527_v24  ;;  %v2566_v24 = vld [vmem:[%s3385_s5 + $0x120] ss:$8 sps:$4 sm:$0xff]  }
 0x17a   :  { %1730 = vmatprep.subr.bf16.mxu0 %v2532_v25  ;;  %v2571_v25 = vld [vmem:[%s3385_s5 + $0x134] ss:$8 sps:$4 sm:$0xff]  }
 0x17d   :  { %1731 = vmatpush1.bf16.msra.mxu0 %v2530_v26  ;;  %v2574_v26 = vld [vmem:[%s3385_s5 + $0x144] ss:$8 sps:$4 sm:$0xff]  }
 0x17e   :  { %1732 = vmatprep.subr.bf16.mxu0 %v2535_v28  ;;  %v2577_v28 = vld [vmem:[%s3385_s5 + $0x154] ss:$8 sps:$4 sm:$0xff]  }
 0x181   :  { %1733 = vmatpush1.bf16.msra.mxu0 %v2533_v27  ;;  %v2572_v27 = vld [vmem:[%s3385_s5 + $0x140] ss:$8 sps:$4 sm:$0xff]  }
 0x182   :  { %1734 = vmatprep.subr.bf16.mxu0 %v2538_v29  ;;  %v2575_v29 = vld [vmem:[%s3385_s5 + $0x150] ss:$8 sps:$4 sm:$0xff]  }
 0x185   :  { %1735 = vmatpush1.bf16.msra.mxu0 %v2536_v30  ;;  %v2580_v30 = vld [vmem:[%s3385_s5 + $0x164] ss:$8 sps:$4 sm:$0xff]  }
 0x186   :  { %1736 = vmatprep.subr.bf16.mxu0 %v2541_v31  ;;  %v2578_v31 = vld [vmem:[%s3385_s5 + $0x160] ss:$8 sps:$4 sm:$0xff]  }
 0x189   :  { %1737 = vmatpush1.bf16.msra.mxu0 %v2539_v32  ;;  %v2583_v32 = vld [vmem:[%s3385_s5 + $0x174] ss:$8 sps:$4 sm:$0xff]  }
 0x18a   :  { %1738 = vmatprep.subr.bf16.mxu0 %v2544_v35  ;;  %v2581_v35 = vld [vmem:[%s3385_s5 + $0x170] ss:$8 sps:$4 sm:$0xff]  }
 0x18d   :  { %1739 = vmatpush1.bf16.msra.mxu0 %v2542_v36  ;;  %v2586_v36 = vld [vmem:[%s3388_s7 + $0x4] ss:$8 sps:$4 sm:$0xff]  }
 0x18e   :  { %1740 = vmatprep.subr.bf16.mxu0 %v2547_v37  ;;  %1938 = vmatprep.mubr.bf16.mxu1 %v2586_v36  ;;  %v1466_v37 = vld [vmem:[%s3389_s6] sm:$0x3] }
 0x191   :  { %1741 = vmatpush1.bf16.msra.mxu0 %v2545_v38  ;;  %v1471_v38 = vrot.slane %v1466_v37, %v3084_v33  ;;  %v2584_v33 = vld [vmem:[%s3388_s7] ss:$8 sps:$4 sm:$0xff]  }
 0x192   :  { %1742 = vmatprep.subr.bf16.mxu0 %v2550_v39  ;;  %v1475_v39 = vrot.slane %v1466_v37, %v3087_v34  ;;  %v2587_v34 = vld [vmem:[%s3388_s7 + $0x14] ss:$8 sps:$4 sm:$0xff]  }
 0x195   :  { %1743 = vmatpush1.bf16.msra.mxu0 %v2548_v40 }
 0x196   :  { %1744 = vmatprep.subr.bf16.mxu0 %v2553_v41 }
 0x199   :  { %1745 = vmatpush1.bf16.msra.mxu0 %v2551_v42 }
 0x19a   :  { %1746 = vmatprep.subr.bf16.mxu0 %v2556_v43 }
 0x19d   :  { %1747 = vmatpush1.bf16.msra.mxu0 %v2554_v44 }
 0x19e   :  { %1748 = vmatprep.subr.bf16.mxu0 %v2559_v45 }
 0x1a1   :  { %1749 = vmatpush1.bf16.msra.mxu0 %v2557_v46 }
 0x1a2   :  { %1761 = vmatprep.subr.bf16.mxu0 %v2562_v47 }
 0x217   :  { %v2254_v49 = vpop.f32.mrb[4].mxu0 }
 0x218   :  { %v2255_v50 = vpop.f32.mrb[5].mxu0 }
 0x219   :  { %v2256_v51 = vadd.f32 %v2255_v50, %v2254_v49  ;;  %v2257_v52 = vpop.f32.mrb[6].mxu0 }
 0x21a   :  { %v2258_v53 = vpop.f32.mrb[7].mxu0 }
 0x21b   :  { %v2259_v54 = vadd.f32 %v2258_v53, %v2257_v52  ;;  %v1362_v59 = vadd.f32 %v2256_v51, %v853_v56 }
 0x21d   :  { %v1365_v2 = vadd.f32 %v2259_v54, %v853_v56  ;;  %v2590_v56 = vld [vmem:[%s3388_s7 + $0x24] ss:$8 sps:$4 sm:$0xff]  }
 0x237   :  { %v1318_v60 = vpop.f32.mrb[8].mxu1  ;;  %v1402_v61 = vpop.f32.mrb[8].mxu0 }
 0x238   :  { %v2293_v62 = vadd.f32 %v1318_v60, %v845_v57  ;;  %v1403_v63 = vadd.f32 %v1402_v61, %v1362_v59  ;;  %v1320_v0 = vpop.f32.mrb[9].mxu1  ;;  %v2287_v1 = vpop.f32.mrb[9].mxu0  ;;  %v2595_v59 = vld [vmem:[%s3388_s7 + $0x30] ss:$8 sps:$4 sm:$0xff]   ;;  %v2596_v60 = vld [vmem:[%s3388_s7 + $0x44] ss:$8 sps:$4 sm:$0xff]  }
 0x239   :  { %v2294_v3 = vadd.f32 %v1320_v0, %v849_v58  ;;  %v1322_v4 = vpop.f32.mrb[10].mxu1  ;;  %v1405_v5 = vpop.f32.mrb[10].mxu0  ;;  %v2598_v61 = vld [vmem:[%s3388_s7 + $0x40] ss:$8 sps:$4 sm:$0xff]   ;;  %v2602_v0 = vld [vmem:[%s3388_s7 + $0x64] ss:$8 sps:$4 sm:$0xff]  }
 0x23a   :  { %v2295_v6 = vadd.f32 %v1322_v4, %v845_v57  ;;  %v1406_v7 = vadd.f32 %v1405_v5, %v1365_v2  ;;  %v1324_v8 = vpop.f32.mrb[11].mxu1  ;;  %v2288_v18 = vpop.f32.mrb[11].mxu0  ;;  %v1409_v9 = vmax.f32 %v2293_v62, 0.0  ;;  %v1411_v11 = vmax.f32 %v1403_v63, 0.0  ;;  %v2592_v57 = vld [vmem:[%s3388_s7 + $0x20] ss:$8 sps:$4 sm:$0xff]  }
 0x23b   :  { %v2296_v19 = vadd.f32 %v1324_v8, %v849_v58  ;;  %v1410_v14 = vmax.f32 %v2294_v3, 0.0  ;;  %v2593_v58 = vld [vmem:[%s3388_s7 + $0x34] ss:$8 sps:$4 sm:$0xff]   ;;  %v2601_v63 = vld [vmem:[%s3388_s7 + $0x50] ss:$8 sps:$4 sm:$0xff]   ;;  %v1989_v4 = vstv %s3390_s8 }
 0x23c   :  { %v1412_v12 = vmax.f32 %v2295_v6, 0.0  ;;  %v1414_v13 = vmax.f32 %v1406_v7, 0.0  ;;  %v2599_v62 = vld [vmem:[%s3388_s7 + $0x54] ss:$8 sps:$4 sm:$0xff]   ;;  %v2604_v1 = vld [vmem:[%s3388_s7 + $0x60] ss:$8 sps:$4 sm:$0xff]  }
 0x23d   :  { %v1413_v10 = vmax.f32 %v2296_v19, 0.0  ;;  %v2605_v2 = vld [vmem:[%s3388_s7 + $0x74] ss:$8 sps:$4 sm:$0xff]   ;;  %v2607_v3 = vld [vmem:[%s3388_s7 + $0x70] ss:$8 sps:$4 sm:$0xff]  }
 0x23e   :  { %v1415_v15 = vpack.c.bf16 %v1412_v12, %v1409_v9  ;;  %v1417_v16 = vpack.c.bf16 %v1414_v13, %v1411_v11 }
 0x23f   :  { %v1416_v17 = vpack.c.bf16 %v1413_v10, %v1410_v14 }
 0x241   :  { %1750 = vmatprep.mubr.bf16.mxu0 %v1416_v17 }
 0x242   :  { %1751 = vmatmul.mubr.bf16.vlgmr.msra.gmra.mrb[12].mxu0 %v1415_v15 }
 0x243   :  { %1762 = vmatpush1.bf16.msra.mxu0 %v2560_v20  ;;  %1793 = vmatprep.mubr.bf16.mxu0 %v2612_v48  ;;  %v2569_v48 = vld [vmem:[%s3385_s5 + $0x130] ss:$8 sps:$4 sm:$0xff]  }
 0x244   :  { %1763 = vmatprep.subr.bf16.mxu0 %v2565_v21 }
 0x247   :  { %1764 = vmatpush1.bf16.msra.mxu0 %v2563_v22 }
 0x248   :  { %1765 = vmatprep.subr.bf16.mxu0 %v2568_v23 }
 0x24b   :  { %1766 = vmatpush1.bf16.msra.mxu0 %v2566_v24 }
 0x24c   :  { %1767 = vmatprep.subr.bf16.mxu0 %v2571_v25 }
 0x24f   :  { %1768 = vmatpush1.bf16.msra.mxu0 %v2569_v48 }
 0x250   :  { %1769 = vmatprep.subr.bf16.mxu0 %v2574_v26 }
 0x253   :  { %1770 = vmatpush1.bf16.msra.mxu0 %v2572_v27 }
 0x254   :  { %1771 = vmatprep.subr.bf16.mxu0 %v2577_v28 }
 0x257   :  { %1772 = vmatpush1.bf16.msra.mxu0 %v2575_v29 }
 0x258   :  { %1773 = vmatprep.subr.bf16.mxu0 %v2580_v30 }
 0x25b   :  { %1774 = vmatpush1.bf16.msra.mxu0 %v2578_v31 }
 0x25c   :  { %1775 = vmatprep.subr.bf16.mxu0 %v2583_v32 }
 0x25f   :  { %1776 = vmatpush1.bf16.msra.mxu0 %v2581_v35 }
 0x262   :  { %1794 = vmatmul.mubr.bf16.vlgmr.msra.gmra.mrb[12].mxu0 %v1417_v16 }
 0x335   :  { %v1795_v40 = vpop.f32.mrb[12].mxu0 }
 0x336   :  { %v2297_v41 = vadd.f32 %v1795_v40, %v1471_v38  ;;  %v1797_v42 = vpop.f32.mrb[13].mxu0 }
 0x337   :  { %v2298_v43 = vadd.f32 %v1797_v42, %v1475_v39  ;;  %v1799_v44 = vpop.f32.mrb[14].mxu0 }
 0x338   :  { %v2299_v45 = vadd.f32 %v1799_v44, %v1471_v38  ;;  %v1801_v46 = vpop.f32.mrb[15].mxu0  ;;  %v1804_v49 = vmax.f32 %v2297_v41, 0.0 }
 0x339   :  { %v2300_v47 = vadd.f32 %v1801_v46, %v1475_v39  ;;  %v1805_v51 = vmax.f32 %v2298_v43, 0.0 }
 0x33a   :  { %v1806_v50 = vmax.f32 %v2299_v45, 0.0 }
 0x33b   :  { %v1807_v52 = vmax.f32 %v2300_v47, 0.0 }
 0x33c   :  { %v1824_v53 = vpack.c.bf16 %v1806_v50, %v1804_v49 }
 0x33d   :  { %v1825_v54 = vpack.c.bf16 %v1807_v52, %v1805_v51 }
 0x33f   :  { %1906 = vmatprep.subr.bf16.mxu1 %v1825_v54 }
 0x340   :  { %1907 = vmatpush1.bf16.xpose.msra.mxu1 %v1824_v53 }
 0x347   :  { %1939 = vmatmul.mubr.bf16.vlgmr.msra.gmra.mrb[12].mxu1 %v2584_v33 }
 0x348   :  { %1945 = vmatprep.mubr.bf16.mxu1 %v2587_v34 }
 0x34f   :  { %1946 = vmatmul.mubr.bf16.gmra.mrb[16].mxu1 %v2589_v55 }
 0x350   :  { %1951 = vmatprep.mubr.bf16.mxu1 %v2590_v56 }
 0x357   :  { %1952 = vmatmul.mubr.bf16.gmra.mrb[20].mxu1 %v2592_v57 }
 0x358   :  { %1957 = vmatprep.mubr.bf16.mxu1 %v2593_v58 }
 0x35f   :  { %1958 = vmatmul.mubr.bf16.gmra.mrb[24].mxu1 %v2595_v59 }
 0x360   :  { %1963 = vmatprep.mubr.bf16.mxu1 %v2596_v60 }
 0x367   :  { %1964 = vmatmul.mubr.bf16.gmra.mrb[28].mxu1 %v2598_v61 }
 0x368   :  { %1969 = vmatprep.mubr.bf16.mxu1 %v2599_v62 }
 0x36f   :  { %1970 = vmatmul.mubr.bf16.gmra.mrb[32].mxu1 %v2601_v63 }
 0x370   :  { %1975 = vmatprep.mubr.bf16.mxu1 %v2602_v0 }
 0x377   :  { %1976 = vmatmul.mubr.bf16.gmra.mrb[36].mxu1 %v2604_v1 }
 0x378   :  { %1981 = vmatprep.mubr.bf16.mxu1 %v2605_v2 }
 0x37f   :  { %1982 = vmatmul.mubr.bf16.gmra.mrb[40].mxu1 %v2607_v3 }
 0x41a   :  { %v1940_v5 = vpop.f32.mrb[12].mxu1 }
 0x41b   :  { %v1990_v6 = vadd.f32 %v1989_v4, %v1940_v5  ;;  %v1942_v7 = vpop.f32.mrb[13].mxu1 }
 0x41c   :  { %v1943_v8 = vpop.f32.mrb[14].mxu1 }
 0x41d   :  { %v1991_v18 = vsub.f32 0.0, %v1990_v6  ;;  %v1944_v19 = vpop.f32.mrb[15].mxu1 }
 0x41f   :  { %v1992_v9 = vmul.f32 1.442695, %v1991_v18 }
 0x421   :  { %2608 = vpow2.f32 %v1992_v9 }
 0x422   :  { %v1947_v11 = vpop.f32.mrb[16].mxu1 }
 0x423   :  { %v1948_v12 = vpop.f32.mrb[17].mxu1 }
 0x424   :  { %v1949_v13 = vpop.f32.mrb[18].mxu1 }
 0x425   :  { %v1950_v14 = vpop.f32.mrb[19].mxu1 }
 0x42a   :  { %v1953_v10 = vpop.f32.mrb[20].mxu1 }
 0x42b   :  { %v2609_v15 = vpop.eup %2608  ;;  %v1954_v16 = vpop.f32.mrb[21].mxu1 }
 0x42c   :  { %v1994_v17 = vadd.f32 1.0, %v2609_v15  ;;  %v1955_v20 = vpop.f32.mrb[22].mxu1 }
 0x42d   :  { %v1956_v21 = vpop.f32.mrb[23].mxu1 }
 0x42e   :  { %2610 = vrcp.f32 %v1994_v17 }
 0x432   :  { %v1959_v22 = vpop.f32.mrb[24].mxu1 }
 0x433   :  { %v1960_v23 = vpop.f32.mrb[25].mxu1 }
 0x434   :  { %v1961_v24 = vpop.f32.mrb[26].mxu1 }
 0x435   :  { %v1962_v25 = vpop.f32.mrb[27].mxu1 }
 0x438   :  { %v2611_v48 = vpop.eup %2610 }
 0x439   :  { %1998 = vst.msk [vmem:[%s3391_s9] sm:$0x1] %vm1997_vm2, %v2611_v48 }
 0x43a   :  { %v1965_v26 = vpop.f32.mrb[28].mxu1 }
 0x43b   :  { %v1966_v27 = vpop.f32.mrb[29].mxu1 }
 0x43c   :  { %v1967_v28 = vpop.f32.mrb[30].mxu1 }
 0x43d   :  { %v1968_v29 = vpop.f32.mrb[31].mxu1 }
 0x442   :  { %v1971_v30 = vpop.f32.mrb[32].mxu1 }
 0x443   :  { %v1972_v31 = vpop.f32.mrb[33].mxu1 }
 0x444   :  { %v1973_v32 = vpop.f32.mrb[34].mxu1 }
 0x445   :  { %v1974_v35 = vpop.f32.mrb[35].mxu1 }
 0x44a   :  { %v1977_v36 = vpop.f32.mrb[36].mxu1 }
 0x44b   :  { %v1978_v37 = vpop.f32.mrb[37].mxu1 }
 0x44c   :  { %v1979_v38 = vpop.f32.mrb[38].mxu1 }
 0x44d   :  { %v1980_v39 = vpop.f32.mrb[39].mxu1 }
 0x452   :  { %v1983_v40 = vpop.f32.mrb[40].mxu1 }
 0x453   :  { %v1984_v41 = vpop.f32.mrb[41].mxu1 }
 0x454   :  { %v1985_v42 = vpop.f32.mrb[42].mxu1 }
 0x455   :  { %v1986_v43 = vpop.f32.mrb[43].mxu1 }

</bundles_post_ra>
